<compile_context>
chip_gen: v6e
topology: v6e:2x2x1
jax: 0.10.0
libtpu: 0.0.40
codegen_flags: <defaults>
</compile_context>

<pallas_src>
import functools

import jax
import jax.numpy as jnp
from jax.experimental import pallas as pl
from jax.experimental.pallas import tpu as pltpu


# ---------------------- generation-aware VMEM budget ----------------------

def _vmem_limit_bytes():
    try:
        cap = int(pltpu.get_tpu_info().vmem_capacity_bytes)
    except Exception:
        cap = 64 << 20  # conservative default (v7x physical size)
    # ~48 MiB under v7x's 64 MiB physical VMEM, ~96 MiB under v5e/v6e's 128 MiB.
    return (96 << 20) if cap >= (128 << 20) else (48 << 20)


_VMEM_LIMIT = _vmem_limit_bytes()
_VMEM_BUDGET = int(_VMEM_LIMIT * 0.85)  # headroom for compiler internal scratch


def _largest_divisor(dim, cap, align):
    """Largest divisor of `dim` that is a multiple of `align` and <= cap (dim if dim <= cap)."""
    if dim <= cap:
        return dim
    t = (cap // align) * align
    while t >= align:
        if dim % t == 0:
            return t
        t -= align
    return dim


# ----------------------------- Pallas kernels -----------------------------

def _gelu_erf(y):
    # exact erf-GELU (matches BERT / cn_clip)
    return 0.5 * y * (1.0 + jax.lax.erf(y * 0.7071067811865476))


def _linear_fullk_kernel(x_ref, w_ref, b_ref, o_ref, *, activation):
    # Full reduction per grid step: no accumulator scratch, no init/finalize phases.
    y = jnp.dot(x_ref[...], w_ref[...], preferred_element_type=jnp.float32)
    y = y + b_ref[...].astype(jnp.float32)
    if activation == "gelu":
        y = _gelu_erf(y)
    o_ref[...] = y.astype(o_ref.dtype)


def _linear_acc_kernel(x_ref, w_ref, b_ref, o_ref, acc_ref, *, activation):
    @pl.when(pl.program_id(2) == 0)
    def _():
        acc_ref[...] = jnp.zeros_like(acc_ref)

    acc_ref[...] += jnp.dot(x_ref[...], w_ref[...],
                            preferred_element_type=jnp.float32)

    @pl.when(pl.program_id(2) == pl.num_programs(2) - 1)
    def _():
        y = acc_ref[...] + b_ref[...].astype(jnp.float32)
        if activation == "gelu":
            y = _gelu_erf(y)
        o_ref[...] = y.astype(o_ref.dtype)


def linear(x, w, b, activation=None, out_dtype=None):
    """y = act(x @ w + b): full-K single-pass matmul with large tiles when VMEM allows."""
    M, K = x.shape
    N = w.shape[1]
    out_dtype = jnp.dtype(out_dtype) if out_dtype is not None else x.dtype
    xb, wb, ob = x.dtype.itemsize, w.dtype.itemsize, out_dtype.itemsize
    cost = pl.CostEstimate(
        flops=2 * M * N * K,
        transcendentals=M * N if activation == "gelu" else 0,
        bytes_accessed=M * K * xb + K * N * wb + M * N * ob,
    )
    b2 = b.reshape(1, N)

    def fullk_fp(tm, tn):
        # double-buffered x / w / out tiles + bias
        return 2 * (tm * K * xb + K * tn * wb + tm * tn * ob + tn * 4)

    choice = None
    for tm_cap, tn_cap in ((2048, 1024), (1024, 1024), (1024, 512), (512, 512),
                           (512, 256), (256, 256), (128, 256), (128, 128),
                           (64, 128), (32, 128), (16, 128), (8, 128)):
        tm_c = _largest_divisor(M, tm_cap, 8)
        tn_c = _largest_divisor(N, tn_cap, 128)
        if fullk_fp(tm_c, tn_c) <= _VMEM_BUDGET:
            choice = (tm_c, tn_c)
            break

    if choice is not None:
        tm, tn = choice
        # Keep >= 2 blocks on a parallel axis so both v7x TensorCores get work.
        if M // tm == 1 and N // tn == 1:
            tm_half = _largest_divisor(M, max(8, tm // 2), 8)
            if tm_half < tm:
                tm = tm_half
            else:
                tn_half = _largest_divisor(N, max(128, tn // 2), 128)
                if tn_half < tn:
                    tn = tn_half
        return pl.pallas_call(
            functools.partial(_linear_fullk_kernel, activation=activation),
            out_shape=jax.ShapeDtypeStruct((M, N), out_dtype),
            grid=(M // tm, N // tn),
            in_specs=[pl.BlockSpec((tm, K), lambda i, j: (i, 0)),
                      pl.BlockSpec((K, tn), lambda i, j: (0, j)),
                      pl.BlockSpec((1, tn), lambda i, j: (0, j))],
            out_specs=pl.BlockSpec((tm, tn), lambda i, j: (i, j)),
            compiler_params=pltpu.CompilerParams(
                dimension_semantics=("parallel", "parallel"),
                vmem_limit_bytes=_VMEM_LIMIT),
            cost_estimate=cost,
        )(x, w, b2)

    # Fallback for K too large to hold a full-K weight slab: K-tiled accumulator path.
    tm = _largest_divisor(M, 256, 8)
    tn = _largest_divisor(N, 512, 128)
    tk = _largest_divisor(K, 2048, 128)
    return pl.pallas_call(
        functools.partial(_linear_acc_kernel, activation=activation),
        out_shape=jax.ShapeDtypeStruct((M, N), out_dtype),
        grid=(M // tm, N // tn, K // tk),
        in_specs=[pl.BlockSpec((tm, tk), lambda i, j, k: (i, k)),
                  pl.BlockSpec((tk, tn), lambda i, j, k: (k, j)),
                  pl.BlockSpec((1, tn), lambda i, j, k: (0, j))],
        out_specs=pl.BlockSpec((tm, tn), lambda i, j, k: (i, j)),
        scratch_shapes=[pltpu.VMEM((tm, tn), jnp.float32)],
        compiler_params=pltpu.CompilerParams(
            dimension_semantics=("parallel", "parallel", "arbitrary"),
            vmem_limit_bytes=_VMEM_LIMIT),
        cost_estimate=cost,
    )(x, w, b2)


def _ln_epilogue(y, g_ref, bt_ref, eps, out_dtype):
    mu = jnp.mean(y, axis=-1, keepdims=True)
    var = jnp.mean(jnp.square(y - mu), axis=-1, keepdims=True)
    yn = (y - mu) * jax.lax.rsqrt(var + eps)
    return (yn * g_ref[...].astype(jnp.float32)
            + bt_ref[...].astype(jnp.float32)).astype(out_dtype)


def _linear_add_ln_fullk_kernel(x_ref, w_ref, b_ref, r_ref, g_ref, bt_ref, o_ref, *, eps):
    y = jnp.dot(x_ref[...], w_ref[...], preferred_element_type=jnp.float32)
    y = y + b_ref[...].astype(jnp.float32) + r_ref[...].astype(jnp.float32)
    o_ref[...] = _ln_epilogue(y, g_ref, bt_ref, eps, o_ref.dtype)


def _linear_add_ln_acc_kernel(x_ref, w_ref, b_ref, r_ref, g_ref, bt_ref, o_ref,
                              acc_ref, *, eps):
    @pl.when(pl.program_id(1) == 0)
    def _():
        acc_ref[...] = jnp.zeros_like(acc_ref)

    acc_ref[...] += jnp.dot(x_ref[...], w_ref[...],
                            preferred_element_type=jnp.float32)

    @pl.when(pl.program_id(1) == pl.num_programs(1) - 1)
    def _():
        y = (acc_ref[...] + b_ref[...].astype(jnp.float32)
             + r_ref[...].astype(jnp.float32))
        o_ref[...] = _ln_epilogue(y, g_ref, bt_ref, eps, o_ref.dtype)


def linear_add_layernorm(x, w, b, res, gamma, beta, eps=1e-12):
    """y = LayerNorm(x @ w + b + res); full-N tile (LN reduces over N), full-K when it fits."""
    M, K = x.shape
    N = w.shape[1]
    xb, wb, ob = x.dtype.itemsize, w.dtype.itemsize, x.dtype.itemsize
    cost = pl.CostEstimate(
        flops=2 * M * N * K + 10 * M * N,
        transcendentals=M,
        bytes_accessed=M * K * xb + K * N * wb + 2 * M * N * ob,
    )
    args = (x, w, b.reshape(1, N), res, gamma.reshape(1, N), beta.reshape(1, N))

    def fullk_fp(tm):
        # double-buffered x / residual / out tiles + full weight slab + vector params
        return 2 * tm * (K * xb + N * xb + N * ob) + 2 * (K * N * wb + 3 * N * 4)

    tm = None
    for cap in (2048, 1024, 512, 256, 128, 64, 32, 16, 8):
        t = _largest_divisor(M, cap, 8)
        if fullk_fp(t) <= _VMEM_BUDGET:
            tm = t
            break

    if tm is not None:
        if M // tm == 1:  # keep both v7x TensorCores busy
            half = _largest_divisor(M, max(8, tm // 2), 8)
            if half < tm:
                tm = half
        return pl.pallas_call(
            functools.partial(_linear_add_ln_fullk_kernel, eps=eps),
            out_shape=jax.ShapeDtypeStruct((M, N), x.dtype),
            grid=(M // tm,),
            in_specs=[pl.BlockSpec((tm, K), lambda i: (i, 0)),
                      pl.BlockSpec((K, N), lambda i: (0, 0)),
                      pl.BlockSpec((1, N), lambda i: (0, 0)),
                      pl.BlockSpec((tm, N), lambda i: (i, 0)),
                      pl.BlockSpec((1, N), lambda i: (0, 0)),
                      pl.BlockSpec((1, N), lambda i: (0, 0))],
            out_specs=pl.BlockSpec((tm, N), lambda i: (i, 0)),
            compiler_params=pltpu.CompilerParams(
                dimension_semantics=("parallel",),
                vmem_limit_bytes=_VMEM_LIMIT),
            cost_estimate=cost,
        )(*args)

    # Fallback: K-tiled accumulator path.
    tm = _largest_divisor(M, 256, 8)
    tk = _largest_divisor(K, 1024, 128)
    return pl.pallas_call(
        functools.partial(_linear_add_ln_acc_kernel, eps=eps),
        out_shape=jax.ShapeDtypeStruct((M, N), x.dtype),
        grid=(M // tm, K // tk),
        in_specs=[pl.BlockSpec((tm, tk), lambda i, k: (i, k)),
                  pl.BlockSpec((tk, N), lambda i, k: (k, 0)),
                  pl.BlockSpec((1, N), lambda i, k: (0, 0)),
                  pl.BlockSpec((tm, N), lambda i, k: (i, 0)),
                  pl.BlockSpec((1, N), lambda i, k: (0, 0)),
                  pl.BlockSpec((1, N), lambda i, k: (0, 0))],
        out_specs=pl.BlockSpec((tm, N), lambda i, k: (i, 0)),
        scratch_shapes=[pltpu.VMEM((tm, N), jnp.float32)],
        compiler_params=pltpu.CompilerParams(
            dimension_semantics=("parallel", "arbitrary"),
            vmem_limit_bytes=_VMEM_LIMIT),
        cost_estimate=cost,
    )(*args)


def _layernorm_kernel(x_ref, g_ref, b_ref, o_ref, *, eps):
    x = x_ref[...].astype(jnp.float32)
    o_ref[...] = _ln_epilogue(x, g_ref, b_ref, eps, o_ref.dtype)


def layernorm(x, gamma, beta, eps=1e-12):
    """Residual-free LayerNorm (embedding LN) — no zeros tensor streamed."""
    M, H = x.shape
    tm = _largest_divisor(M, 1024, 8)
    if M // tm == 1:
        half = _largest_divisor(M, max(8, tm // 2), 8)
        if half < tm:
            tm = half
    return pl.pallas_call(
        functools.partial(_layernorm_kernel, eps=eps),
        out_shape=jax.ShapeDtypeStruct((M, H), x.dtype),
        grid=(M // tm,),
        in_specs=[pl.BlockSpec((tm, H), lambda i: (i, 0)),
                  pl.BlockSpec((1, H), lambda i: (0, 0)),
                  pl.BlockSpec((1, H), lambda i: (0, 0))],
        out_specs=pl.BlockSpec((tm, H), lambda i: (i, 0)),
        compiler_params=pltpu.CompilerParams(
            dimension_semantics=("parallel",),
            vmem_limit_bytes=_VMEM_LIMIT),
    )(x, gamma.reshape(1, H), beta.reshape(1, H))


def _attention_kernel(q_ref, k_ref, v_ref, bias_ref, o_ref, *, heads, head_dim, scale):
    # q/k/v blocks are [S, heads*Dh] column slices of the fused QKV buffer.
    S = q_ref.shape[0]
    # bf16 MXU operands (no f32 up-cast); f32 accumulation via preferred_element_type.
    q = q_ref[...].reshape(S, heads, head_dim)
    k = k_ref[...].reshape(S, heads, head_dim)
    v = v_ref[...].reshape(S, heads, head_dim)
    bias = bias_ref[0]                                  # [1, S] additive key mask (0 / -1e9)
    # All heads batched in one dot_general -> back-to-back MXU pushes, no per-head loop.
    s = jnp.einsum("qhd,khd->hqk", q, k, preferred_element_type=jnp.float32)
    s = s * scale + bias[None]                          # softmax math stays in f32
    s = s - jnp.max(s, axis=-1, keepdims=True)
    p = jnp.exp(s)
    # approx reciprocal uses the EUP slot; ~1e-3 rel error vs exact divide (inference OK).
    inv = pl.reciprocal(jnp.sum(p, axis=-1, keepdims=True), approx=True)
    ctx = jnp.einsum("hqk,khd->hqd", p.astype(v.dtype), v,
                     preferred_element_type=jnp.float32)
    ctx = (ctx * inv).astype(o_ref.dtype)               # cast before the merge relayout
    # single lane-dense store of the whole head group
    o_ref[...] = jnp.swapaxes(ctx, 0, 1).reshape(S, heads * head_dim)


def attention(qkv, mask_bias, *, batch, seq, num_heads, head_dim):
    """qkv: [B*S, 3H] fused projections; mask_bias: [B, 1, S] additive key mask.

    Returns ctx as [B*S, H] (heads merged via the output BlockSpec).
    """
    H = num_heads * head_dim
    scale = 1.0 / (head_dim ** 0.5)
    ib = qkv.dtype.itemsize
    # Largest head group whose block is lane-dense (width % 128 == 0) and fits VMEM
    # (typically ALL heads) -> minimal grid steps per layer.
    hpb = None
    for d in range(num_heads, 0, -1):
        if num_heads % d:
            continue
        bw = d * head_dim
        if bw % 128:
            continue
        fp = 2 * 4 * seq * bw * ib + 8 * d * seq * seq + 8 * seq
        if fp <= _VMEM_BUDGET:
            hpb = d
            break
    if hpb is None:
        # TODO(synk): pad head_dim so a head-group width can hit a 128-lane multiple.
        hpb = num_heads
    nhb = num_heads // hpb
    bw = hpb * head_dim
    return pl.pallas_call(
        functools.partial(_attention_kernel, heads=hpb, head_dim=head_dim, scale=scale),
        out_shape=jax.ShapeDtypeStruct((batch * seq, H), qkv.dtype),
        grid=(batch, nhb),
        in_specs=[pl.BlockSpec((seq, bw), lambda b, h: (b, h)),
                  pl.BlockSpec((seq, bw), lambda b, h: (b, nhb + h)),
                  pl.BlockSpec((seq, bw), lambda b, h: (b, 2 * nhb + h)),
                  pl.BlockSpec((1, 1, seq), lambda b, h: (b, 0, 0))],
        out_specs=pl.BlockSpec((seq, bw), lambda b, h: (b, h)),
        compiler_params=pltpu.CompilerParams(
            dimension_semantics=("parallel", "parallel"),
            vmem_limit_bytes=_VMEM_LIMIT),
    )(qkv, qkv, qkv, mask_bias)


# ------------------------------ model (glue) ------------------------------

def init_params(key, vocab, max_pos, hidden, num_layers, ffn, proj):
    std = 0.02
    wdt = jnp.bfloat16
    keys = jax.random.split(key, 4 + num_layers)
    params = {
        "tok_emb": (jax.random.normal(keys[0], (vocab, hidden), jnp.float32) * std).astype(wdt),
        "pos_emb": (jax.random.normal(keys[1], (max_pos, hidden), jnp.float32) * std).astype(wdt),
        "type_emb": (jax.random.normal(keys[2], (2, hidden), jnp.float32) * std).astype(wdt),
        "emb_ln_g": jnp.ones((hidden,), jnp.float32),
        "emb_ln_b": jnp.zeros((hidden,), jnp.float32),
        "text_projection": (jax.random.normal(keys[3], (hidden, proj), jnp.float32)
                            * (hidden ** -0.5)).astype(wdt),
        "layers": [],
    }
    for l in range(num_layers):
        lk = jax.random.split(keys[4 + l], 4)
        layer = {
            # fused QKV projection: [H, 3H]
            "wqkv": (jax.random.normal(lk[0], (hidden, 3 * hidden), jnp.float32) * std).astype(wdt),
            "bqkv": jnp.zeros((3 * hidden,), jnp.float32),
            "wo": (jax.random.normal(lk[1], (hidden, hidden), jnp.float32) * std).astype(wdt),
            "bo": jnp.zeros((hidden,), jnp.float32),
            "ln1_g": jnp.ones((hidden,), jnp.float32), "ln1_b": jnp.zeros((hidden,), jnp.float32),
            "w1": (jax.random.normal(lk[2], (hidden, ffn), jnp.float32) * std).astype(wdt),
            "b1": jnp.zeros((ffn,), jnp.float32),
            "w2": (jax.random.normal(lk[3], (ffn, hidden), jnp.float32) * std).astype(wdt),
            "b2": jnp.zeros((hidden,), jnp.float32),
            "ln2_g": jnp.ones((hidden,), jnp.float32), "ln2_b": jnp.zeros((hidden,), jnp.float32),
        }
        params["layers"].append(layer)
    return params


def encode_text(text, params, *, num_heads, pad_id):
    B, S = text.shape
    H = params["tok_emb"].shape[1]
    DH = H // num_heads

    # Pad S up to a multiple of 8 so every kernel sees aligned sublane dims
    # (real CN-CLIP S=52/77); extra positions are PAD tokens and masked below.
    S_pad = ((S + 7) // 8) * 8
    if S_pad != S:
        text = jnp.pad(text, ((0, 0), (0, S_pad - S)), constant_values=pad_id)
    S = S_pad

    # attn_mask = text.ne(PAD) -> additive key bias [B, 1, S]; never replicated per head.
    mask_bias = jnp.where(text != pad_id, 0.0, -1e9).astype(jnp.float32)[:, None, :]

    # embeddings (gather is XLA glue) + residual-free LayerNorm (Pallas)
    x = (params["tok_emb"][text]
         + params["pos_emb"][:S][None]
         + params["type_emb"][0][None, None])
    x = x.reshape(B * S, H)                       # bf16 activations
    x = layernorm(x, params["emb_ln_g"], params["emb_ln_b"])

    for p in params["layers"]:
        # fused QKV projection: one full-K matmul, x read once
        qkv = linear(x, p["wqkv"], p["bqkv"])                     # [B*S, 3H]
        # attention reads head-group columns straight out of qkv via BlockSpecs
        ctx = attention(qkv, mask_bias, batch=B, seq=S,
                        num_heads=num_heads, head_dim=DH)         # [B*S, H]
        # W_o matmul with fused residual-add + LayerNorm epilogue
        x = linear_add_layernorm(ctx, p["wo"], p["bo"], x, p["ln1_g"], p["ln1_b"])
        # FFN: up-projection with exact erf-GELU, then down-projection fused with add+LN
        h = linear(x, p["w1"], p["b1"], activation="gelu")
        x = linear_add_layernorm(h, p["w2"], p["b2"], x, p["ln2_g"], p["ln2_b"])

    # [CLS] pooling + tiny [B,H] x [H,proj] projection in plain XLA: a pallas_call
    # launch + full-weight DMA would cost more than the matmul itself at M=B.
    cls = x.reshape(B, S, H)[:, 0, :].astype(jnp.float32)
    return cls @ params["text_projection"].astype(jnp.float32)    # [B, proj] f32


# ---------------------------------- main -----------------------------------

if __name__ == "__main__":
    # Toy shapes: hidden chosen so the all-heads group lane width hits 128 (Dh=32, 4 heads).
    B, S, H, NH, FFN, VOCAB, LAYERS, PROJ = 2, 8, 128, 4, 256, 64, 2, 128
    PAD_ID = 0

    key = jax.random.PRNGKey(0)
    pkey, tkey = jax.random.split(key)
    params = init_params(pkey, VOCAB, S, H, LAYERS, FFN, PROJ)

    tokens = jax.random.randint(tkey, (B, S), 1, VOCAB, dtype=jnp.int32)
    tokens = tokens.at[1, 5:].set(PAD_ID)  # pad the tail of the second sequence

    out = encode_text(tokens, params, num_heads=NH, pad_id=PAD_ID)
    out = jax.block_until_ready(out)
    assert out.shape == (B, PROJ) and out.dtype == jnp.float32
    print("KERNEL_OK")
</pallas_src>

<mosaic_0001>
module attributes {stable_mosaic.version = 11 : i64} {
  func.func @_layernorm_kernel(%arg0: i32, %arg1: memref<8x128xbf16, #tpu.memory_space<vmem>>, %arg2: memref<1x128xf32, #tpu.memory_space<vmem>>, %arg3: memref<1x128xf32, #tpu.memory_space<vmem>>, %arg4: memref<8x128xbf16, #tpu.memory_space<vmem>>) attributes {dimension_semantics = [#tpu.dimension_semantics<parallel>], iteration_bounds = array<i64: 2>, scalar_prefetch = 0 : i64, scratch_operands = 0 : i64, tpu.core_type = #tpu.core_type<tc>, window_params = [{transform_indices = @transform_0, window_bounds = array<i64: 8, 128>}, {pipeline_mode = #tpu.pipeline_mode<synchronous>, transform_indices = @transform_1, window_bounds = array<i64: 1, 128>}, {pipeline_mode = #tpu.pipeline_mode<synchronous>, transform_indices = @transform_2, window_bounds = array<i64: 1, 128>}, {transform_indices = @transform_3, window_bounds = array<i64: 8, 128>}]} {
    %c0 = arith.constant 0 : index
    %c0_0 = arith.constant 0 : index
    %0 = vector.load %arg1[%c0, %c0_0] : memref<8x128xbf16, #tpu.memory_space<vmem>>, vector<8x128xbf16>
    %1 = arith.extf %0 : vector<8x128xbf16> to vector<8x128xf32>
    %cst = arith.constant dense<0.000000e+00> : vector<8xf32>
    %2 = vector.multi_reduction <add>, %1, %cst [1] : vector<8x128xf32> to vector<8xf32>
    %3 = vector.shape_cast %2 : vector<8xf32> to vector<8x1xf32>
    %cst_1 = arith.constant 1.280000e+02 : f32
    %4 = vector.broadcast %cst_1 : f32 to vector<8x1xf32>
    %5 = arith.divf %3, %4 : vector<8x1xf32>
    %6 = vector.broadcast %5 : vector<8x1xf32> to vector<8x128xf32>
    %7 = arith.subf %1, %6 : vector<8x128xf32>
    %8 = arith.mulf %7, %7 : vector<8x128xf32>
    %cst_2 = arith.constant dense<0.000000e+00> : vector<8xf32>
    %9 = vector.multi_reduction <add>, %8, %cst_2 [1] : vector<8x128xf32> to vector<8xf32>
    %10 = vector.shape_cast %9 : vector<8xf32> to vector<8x1xf32>
    %cst_3 = arith.constant 1.280000e+02 : f32
    %11 = vector.broadcast %cst_3 : f32 to vector<8x1xf32>
    %12 = arith.divf %10, %11 : vector<8x1xf32>
    %13 = vector.broadcast %5 : vector<8x1xf32> to vector<8x128xf32>
    %14 = arith.subf %1, %13 : vector<8x128xf32>
    %cst_4 = arith.constant 9.99999996E-13 : f32
    %15 = vector.broadcast %cst_4 : f32 to vector<8x1xf32>
    %16 = arith.addf %12, %15 : vector<8x1xf32>
    %17 = math.rsqrt %16 : vector<8x1xf32>
    %18 = vector.broadcast %17 : vector<8x1xf32> to vector<8x128xf32>
    %19 = arith.mulf %14, %18 : vector<8x128xf32>
    %c0_5 = arith.constant 0 : index
    %c0_6 = arith.constant 0 : index
    %20 = vector.load %arg2[%c0_5, %c0_6] : memref<1x128xf32, #tpu.memory_space<vmem>>, vector<1x128xf32>
    %21 = vector.broadcast %20 : vector<1x128xf32> to vector<8x128xf32>
    %22 = arith.mulf %19, %21 : vector<8x128xf32>
    %c0_7 = arith.constant 0 : index
    %c0_8 = arith.constant 0 : index
    %23 = vector.load %arg3[%c0_7, %c0_8] : memref<1x128xf32, #tpu.memory_space<vmem>>, vector<1x128xf32>
    %24 = vector.broadcast %23 : vector<1x128xf32> to vector<8x128xf32>
    %25 = arith.addf %22, %24 : vector<8x128xf32>
    %26 = arith.truncf %25 : vector<8x128xf32> to vector<8x128xbf16>
    %c0_9 = arith.constant 0 : index
    %c0_10 = arith.constant 0 : index
    %27 = vector.load %arg4[%c0_9, %c0_10] : memref<8x128xbf16, #tpu.memory_space<vmem>>, vector<8x128xbf16>
    tpu.vector_store %arg4[%c0_9, %c0_10], %26 {strides = array<i32>} : memref<8x128xbf16, #tpu.memory_space<vmem>>, vector<8x128xbf16>,
    return
  }
  func.func @transform_0(%arg0: i32) -> (i32, i32) {
    %c0_i32 = arith.constant 0 : i32
    %c0_i32_0 = arith.constant 0 : i32
    return %arg0, %c0_i32 : i32, i32
  }
  func.func @transform_1(%arg0: i32) -> (i32, i32) {
    %c0_i32 = arith.constant 0 : i32
    %c0_i32_0 = arith.constant 0 : i32
    %c0_i32_1 = arith.constant 0 : i32
    return %c0_i32, %c0_i32_0 : i32, i32
  }
  func.func @transform_2(%arg0: i32) -> (i32, i32) {
    %c0_i32 = arith.constant 0 : i32
    %c0_i32_0 = arith.constant 0 : i32
    %c0_i32_1 = arith.constant 0 : i32
    return %c0_i32, %c0_i32_0 : i32, i32
  }
  func.func @transform_3(%arg0: i32) -> (i32, i32) {
    %c0_i32 = arith.constant 0 : i32
    %c0_i32_0 = arith.constant 0 : i32
    return %arg0, %c0_i32 : i32, i32
  }
}

</mosaic_0001>

<bundles_post_ra>
// kernel: tpu_custom_call.1
= control target key start
LH: loop header
LB: loop body
LE: loop exit
PB: predicated region body
PF: predicated region fallthrough
CT: control target
= control target key end

     0   :  { %8 = vsyncpa [#allocation3], 0  ;;  %s627_s0 = inlined_call_operand.hbm [shape: bf16[16,128], index: 0, kind: input, shape index: {}]   ;;  %s628_s1 = inlined_call_operand.vmem [shape: f32[1,128], index: 1, kind: input, shape index: {}]   ;;  %s629_s2 = inlined_call_operand.vmem [shape: f32[1,128], index: 2, kind: input, shape index: {}]   ;;  %s630_s3 = inlined_call_operand.hbm [shape: bf16[16,128], index: 3, kind: output, shape index: {}]  }
   0x1   :  { %10 = vsyncpa [#allocation3 + $0x1], 0 }
   0x2   :  { %11 = vsyncpa [#allocation4], 0 }
   0x3   :  { %13 = vsyncpa [#allocation4 + $0x1], 0  ;;  %s480_s12 = smov 0   ;;  %s482_s13 = smov 0  }
   0x4   :  { %s484_s14 = smov 0   ;;  %s486_s15 = smov 0  }
   0x5 LB: > { %s501_s16 = sadd.s32 4294967295, %s456_s15   ;;  %s302_s17 = sadd.s32 4294967294, %s456_s15   ;;  %s456_s15 = sphi %s486_s15, %s647_s15   ;;  %s452_s14 = sphi %s484_s14, %s646_s14   ;;  %s448_s13 = sphi %s482_s13, %s645_s13   ;;  %s444_s12 = sphi %s480_s12, %s644_s12  }
   0x6   : > { %s505_s18 = sadd.s32 1, %s456_s15   ;;  %s26_s19 = sadd.s32 1, %s452_s14 }
   0x7   : > { %s23_s20 = ssub.s32 %s456_s15, %s505_s18  ;;  %p33_p0 = scmp.ne.s32.totalorder %s452_s14, %s448_s13 }
   0x8   : > { %p24_p1 = scmp.eq.s32.totalorder %s23_s20, 0  ;;  %p34_p2 = scmp.eq.s32.totalorder %s456_s15, 0 }
   0x9   : > { %p39_p3 = scmp.ne.s32.totalorder %s448_s13, %s444_s12  ;;  %p40_p4 = scmp.eq.s32.totalorder %s501_s16, 0 }
   0xa   : > { %s517_s21 = scalar_select %p24_p1, %s452_s14, %s26_s19  }
   0xb   : > { %p519_p5 = por %p34_p2, %p33_p0  ;;  %p523_p6 = por %p40_p4, %p39_p3 }
   0xc   : > { %p105_p7 = scmp.eq.s32.totalorder %s501_s16, 1  ;;  %p111_p8 = scmp.eq.s32.totalorder %s302_s17, 1 }
   0xd   : > { %s634_s23 = scalar_select %p523_p6, 1, 0 }
   0xe   : > { %p328_p10 = scmp.lt.s32.totalorder %s456_s15, 2  ;;  %p530_p11 = por %p105_p7, %p33_p0 }
   0xf   : > { %p534_p12 = por %p111_p8, %p39_p3  ;;  %s137_s26 = sand.u32 1, %s452_s14  }
  0x10   : > { %s635_s24 = scalar_select %p530_p11, 1, 0 }
  0x11   : > { %s636_s25 = scalar_select %p534_p12, 1, 0 }
  0x12   : > { %s306_s27 = sshll.u32 %s456_s15, 6  ;;  %s305_s28 = sshll.u32 %s137_s26, 2 }
  0x13   : > { %s543_s4 = scalar_lea.hbm %s627_s0, %s306_s27  ;;  %s141_s5 = scalar_lea.vmem [#allocation2], %s305_s28 }
  0x14   : > { %s148_s6 = sshll.u32 %s141_s5, 4  ;;  %p547_p13 = pnand %p328_p10, %p519_p5  ;;  %s551_s6 = int_to_ptr.vmem [resolvable:$true] %s148_s6 }
  0x15   : > { %s138_s8 = scalar_lea.sflag [#allocation3], %s137_s26  ;;  %s364_s9 = scalar_lea.hbm %s543_s4, 64 }
  0x16   : > { %p365_p2 = scmp.ne.s32.totalorder %s543_s4, %s364_s9  ;;  %p366_p3 = pneg %p547_p13 }
  0x17   : > { %s369_s17 = scalar_lea.hbm %s627_s0, 128  ;;  %p370_p5 = scmp.lt.s32.totalorder %s543_s4, %s627_s0 }
  0x18   : > { %p367_p4 = pnand %p366_p3, %p365_p2  ;;  %p371_p8 = scmp.lt.s32.totalorder %s369_s17, %s364_s9 }
  0x1a   : > { %p368_p7 = pneg %p367_p4  ;;  %p372_p10 = por %p371_p8, %p370_p5 }
  0x1c   : > { %p373_p9 = pnand %p372_p10, %p368_p7 }
  0x1e   : > { %376 = shalt.err (!%p373_p9)
}
  0x1f   : > { %s377_s22 = scalar_lea.vmem %s551_s6, 64  ;;  %s458_s26 = smov [#allocation2]  }
  0x20   : > { %p378_p0 = scmp.ne.s32.totalorder %s551_s6, %s377_s22  ;;  %s382_s27 = sshll.u32 %s458_s26, 4  ;;  %s383_s27 = int_to_ptr.vmem [resolvable:$false] %s382_s27 }
  0x21   : > { %s384_s28 = scalar_lea.vmem %s383_s27, 128  ;;  %p385_p4 = scmp.lt.s32.totalorder %s551_s6, %s383_s27 }
  0x22   : > { %p380_p1 = pnand %p378_p0, %p366_p3  ;;  %p386_p12 = scmp.lt.s32.totalorder %s384_s28, %s377_s22 }
  0x24   : > { %p381_p2 = pneg %p380_p1  ;;  %p387_p11 = por %p386_p12, %p385_p4 }
  0x26   : > { %p388_p6 = pnand %p387_p11, %p381_p2 }
  0x28   : > { %391 = shalt.err (!%p388_p6)
}
  0x29   : > { %323 = dma.hbm_to_vmem [thread:$0]  (!%p547_p13), %s543_s4, 64, %s551_s6, %s138_s8  }
  0x2a   : > { %p638_p9 = scmp.lt.s32.totalorder %s456_s15, 3  ;;  %p639_p7 = scmp.ge.s32.totalorder %s456_s15, 1 }
  0x2c   : > { %p154_p0 = pnand %p639_p7, %p638_p9 }
  0x2d   : > { %s578_s29 = sand.u32 (!%p154_p0), 1, %s448_s13   ;;  %p640_p6 = scmp.ne.s32.totalorder (!%p154_p0), %s634_s23, 0 }
  0x2e   : > { %157 = sbr.rel (%p154_p0) target bundleno = 376 (0x178), region = 32  ;;  %s308_s30 = sshll.u32 (!%p154_p0), %s578_s29, 2 }
  0x2f   : > { %s160_s5 = scalar_lea.sflag (!%p154_p0), [#allocation3], %s578_s29  ;;  %s163_s9 = scalar_lea.vmem (!%p154_p0), [#allocation2], %s308_s30 }
  0x33   : > { %435 = dma.done.wait (%p640_p6), %s160_s5, 64  }
  0x34   : > { %437 = vsyncadd (%p640_p6), %s160_s5, 4294967232  ;;  %v186_v0 = vld [vmem:[%s163_s9] sm:$0xf]  ;;  %s313_s8 = sshll.u32 %s501_s16, 6  ;;  %s185_s10 = scalar_lea.vmem [#allocation5], %s308_s30 }
  0x35   : > { %v187_v1 = vunpack.c.l.bf16 %v186_v0  ;;  %v310_v10 = vld [vmem:[%s628_s1] ss:$0 sm:$0xff]  ;;  %s232_s11 = sshll.u32 %s185_s10, 4  ;;  %s230_s20 = scalar_lea.hbm %s630_s3, %s313_s8  ;;  %s233_s11 = int_to_ptr.vmem [resolvable:$true] %s232_s11 }
  0x36   : > { %v311_v12 = vld [vmem:[%s629_s2] ss:$0 sm:$0xff]  ;;  %s219_s22 = scalar_lea.sflag [#allocation4], %s578_s29  ;;  %s392_s26 = scalar_lea.vmem %s233_s11, 64 }
  0x37   : > { %188 = vadd.xlane.f32.xlu0 %v187_v1  ;;  %p393_p11 = scmp.ne.s32.totalorder %s233_s11, %s392_s26  ;;  %p641_p12 = scmp.ne.s32.totalorder %s635_s24, 0 }
  0x38   : > { %s459_s27 = smov [#allocation5]  }
  0x39   : > { %p394_p13 = pnand %p393_p11, %p641_p12  ;;  %s396_s28 = sshll.u32 %s459_s27, 4  ;;  %s397_s28 = int_to_ptr.vmem [resolvable:$false] %s396_s28 }
  0x3a   : > { %s398_s16 = scalar_lea.vmem %s397_s28, 128  ;;  %p399_p3 = scmp.lt.s32.totalorder %s233_s11, %s397_s28 }
  0x3b   : > { %p395_p1 = pneg %p394_p13  ;;  %p400_p5 = scmp.lt.s32.totalorder %s398_s16, %s392_s26 }
  0x3d   : > { %p401_p8 = por %p400_p5, %p399_p3 }
  0x3f   : > { %p402_p10 = pnand %p401_p8, %p395_p1 }
  0xc0   : > { %v189_v2 = vpop.xlane.xlu0 %188 }
  0xc1   : > { %v191_v3 = vmul.f32 0.0078125, %v189_v2 }
  0xc3   : > { %v192_v4 = vsub.f32 %v187_v1, %v191_v3 }
  0xc5   : > { %v193_v5 = vmul.f32 %v192_v4, %v192_v4 }
  0xc7   : > { %194 = vadd.xlane.f32.xlu0 %v193_v5 }
 0x150   : > { %v195_v6 = vpop.xlane.xlu0 %194 }
 0x151   : > { %v196_v7 = vmul.f32 0.0078125, %v195_v6 }
 0x153   : > { %v197_v8 = vadd.f32 1e-12, %v196_v7 }
 0x155   : > { %362 = vrsqrt.f32 %v197_v8 }
 0x162   : > { %v363_v9 = vpop.eup %362 }
 0x163   : > { %v199_v11 = vmul.f32 %v363_v9, %v192_v4 }
 0x165   : > { %v207_v13 = vmul.f32 %v310_v10, %v199_v11 }
 0x167   : > { %v215_v14 = vadd.f32 %v311_v12, %v207_v13 }
 0x169   : > { %v216_v15 = vpack.c.bf16 %v215_v14, %v215_v14 }
 0x16b   : > { %217 = vst [vmem:[%s185_s10] sm:$0xf] %v216_v15 }
 0x16c   : > { %405 = shalt.err (!%p402_p10)
}
 0x16d   : > { %s406_s30 = scalar_lea.hbm %s230_s20, 64  ;;  %s410_s9 = scalar_lea.hbm %s630_s3, 128 }
 0x16e   : > { %p407_p2 = scmp.ne.s32.totalorder %s230_s20, %s406_s30  ;;  %p411_p7 = scmp.lt.s32.totalorder %s230_s20, %s630_s3 }
 0x16f   : > { %p412_p0 = scmp.lt.s32.totalorder %s410_s9, %s406_s30 }
 0x170   : > { %p408_p4 = pnand %p407_p2, %p641_p12 }
 0x171   : > { %p413_p6 = por %p412_p0, %p411_p7 }
 0x172   : > { %p409_p9 = pneg %p408_p4 }
 0x174   : > { %p414_p11 = pnand %p413_p6, %p409_p9 }
 0x176   : > { %417 = shalt.err (!%p414_p11)
}
 0x177   : > { %318 = dma.vmem_to_hbm [thread:$0]  (%p641_p12), %s233_s11, 64, %s230_s20, %s219_s22  }
 0x178 PF: > { %s244_s23 = sand.u32 1, %s444_s12   ;;  %p642_p13 = scmp.ne.s32.totalorder %s636_s25, 0 }
 0x179   : > { %p643_p1 = scmp.ge.s32.totalorder %s456_s15, 2  ;;  %s245_s7 = scalar_lea.sflag [#allocation4], %s244_s23 }
 0x17b   : > { %p325_p3 = pnand %p643_p1, %p642_p13 }
 0x17d   : > { %p326_p5 = pneg %p325_p3 }
 0x17f   : > { %439 = dma.done.wait (%p326_p5), %s245_s7, 64  }
 0x180   : > { %441 = vsyncadd (%p326_p5), %s245_s7, 4294967232  ;;  %p16_p8 = scmp.ge.s32.totalorder %s505_s18, 4   ;;  %s644_s12 = smov %s448_s13 }
 0x181   : > { %s645_s13 = smov %s452_s14  ;;  %s646_s14 = smov %s517_s21 }
 0x182   : > { %s647_s15 = smov %s505_s18  ;;  %18 = sbr.rel (!%p16_p8) target bundleno = 5 (0x5), region = 77 }
 0x187   :  { %250 = vsyncpa [#allocation3], 1 }
 0x188   :  { %252 = vsyncpa [#allocation3 + $0x1], 1 }
 0x189   :  { %253 = vsyncpa [#allocation4], 1 }
 0x18a   :  { %255 = vsyncpa [#allocation4 + $0x1], 1 }

</bundles_post_ra>
